<compile_context>
chip_gen: v7x
topology: tpu7x:2x2x1
jax: 0.10.0
libtpu: 0.0.40
codegen_flags: <defaults>
</compile_context>

<pallas_src>
import functools
import math

import jax
import jax.numpy as jnp
from jax.experimental import pallas as pl
from jax.experimental.pallas import tpu as pltpu


def _round_up(x, m):
    return ((x + m - 1) // m) * m


def _vmem_limit_bytes():
    """Scoped-VMEM request derived from the physical capacity per chip gen."""
    try:
        cap = pltpu.get_tpu_info().vmem_capacity_bytes
    except Exception:  # no TPU info available -> conservative default
        cap = 64 * 1024 * 1024
    # Request at most half of physical VMEM; leaves headroom for compiler
    # scratch, semaphores and buffers not accounted for in the tile plan.
    return int(min(cap // 2, 64 * 1024 * 1024))


def _pad_n(n):
    """Padded node count. Depends only on n, so one padded adjacency can be
    shared by every layer of a forward pass."""
    if n < 512:
        return _round_up(max(n, 8), 8)
    return _round_up(n, 512)


def _plan_pass1(d_in):
    """(d_in_pad, blk_k1) for support = feat @ W. K-tile only when D_in is
    large enough that a full-width feat tile would strain VMEM."""
    if d_in <= 1024:
        return d_in, d_in
    return _round_up(d_in, 512), 512


def _plan_pass2(n_pad, d_out_pad, adj_itemsize, budget):
    """(blk_m, blk_k, support_resident) for out = adj @ support."""
    if n_pad < 512:
        return n_pad, n_pad, False
    blk_m = 256                                  # >= 2 row tiles for megacore
    out_bytes = 2 * blk_m * d_out_pad * 4        # double-buffered f32 out
    sup_res_bytes = 2 * n_pad * d_out_pad * 4    # whole support, f32
    support_resident = sup_res_bytes <= budget // 3
    for blk_k in (4096, 2048, 1024, 512):        # n_pad is a multiple of 512
        if n_pad % blk_k:
            continue
        sup_bytes = (sup_res_bytes if support_resident
                     else 2 * blk_k * d_out_pad * 4)
        adj_bytes = 2 * blk_m * blk_k * adj_itemsize
        if adj_bytes + sup_bytes + out_bytes <= budget:
            return blk_m, blk_k, support_resident
    return blk_m, 512, False


def prepare_adj(adj, *, adj_dtype=None):
    """Pad (and optionally cast) the dense adjacency once per forward.

    Safe to call on an already-prepared adjacency: it is returned unchanged,
    so several layers can share a single padded copy (no duplicate HBM
    pad/cast pass per layer)."""
    n = adj.shape[0]
    n_pad = _pad_n(n)
    if adj_dtype is not None and adj.dtype != jnp.dtype(adj_dtype):
        adj = adj.astype(adj_dtype)
    if n_pad != n:
        adj = jnp.pad(adj, ((0, n_pad - n), (0, n_pad - n)))
    return adj


# --------------------- pass 1: support = feat @ W ---------------------------

def _support_kernel(feat_ref, w_ref, out_ref):
    k = pl.program_id(1)

    @pl.when(k == 0)
    def _():
        out_ref[...] = jnp.zeros_like(out_ref)

    # f32 output block is the accumulator (constant block index along k).
    out_ref[...] += jnp.dot(feat_ref[...], w_ref[...],
                            preferred_element_type=jnp.float32)


def _compute_support(feat_p, w_p, blk_m, blk_k1, vmem_limit):
    n_pad, d_in_pad = feat_p.shape
    d_out_pad = w_p.shape[1]
    flops = 2 * n_pad * d_in_pad * d_out_pad
    bytes_accessed = (feat_p.size * feat_p.dtype.itemsize
                      + (n_pad // blk_m) * w_p.size * w_p.dtype.itemsize
                      + n_pad * d_out_pad * 4)
    return pl.pallas_call(
        _support_kernel,
        out_shape=jax.ShapeDtypeStruct((n_pad, d_out_pad), jnp.float32),
        grid_spec=pltpu.PrefetchScalarGridSpec(
            num_scalar_prefetch=0,
            grid=(n_pad // blk_m, d_in_pad // blk_k1),
            in_specs=[
                pl.BlockSpec((blk_m, blk_k1), lambda i, k: (i, k)),
                pl.BlockSpec((blk_k1, d_out_pad), lambda i, k: (k, 0)),
            ],
            out_specs=pl.BlockSpec((blk_m, d_out_pad), lambda i, k: (i, 0)),
        ),
        compiler_params=pltpu.CompilerParams(
            dimension_semantics=("parallel", "arbitrary"),
            vmem_limit_bytes=vmem_limit),
        cost_estimate=pl.CostEstimate(flops=flops, transcendentals=0,
                                      bytes_accessed=bytes_accessed),
    )(feat_p, w_p)


# ----------------- pass 2: out = adj @ support + bias (+relu) ---------------

def _adj_matmul_kernel(adj_ref, sup_ref, b_ref, out_ref, *,
                       apply_relu, blk_k, support_resident):
    k = pl.program_id(1)

    @pl.when(k == 0)
    def _():
        out_ref[...] = jnp.zeros_like(out_ref)

    if support_resident:
        # Whole support lives in VMEM (constant index map); slice the k-block.
        k_off = pl.multiple_of(k * blk_k, blk_k)
        sup = sup_ref[pl.ds(k_off, blk_k), :]
    else:
        sup = sup_ref[...]

    a = adj_ref[...]
    if a.dtype != jnp.float32:
        # bf16-streamed adjacency: run the MXU in the streaming dtype with
        # f32 accumulation (support stays f32 in HBM).
        sup = sup.astype(a.dtype)
    out_ref[...] += jnp.dot(a, sup, preferred_element_type=jnp.float32)

    @pl.when(k == pl.num_programs(1) - 1)
    def _():
        out = out_ref[...] + b_ref[...]
        if apply_relu:
            out = jnp.maximum(out, 0.0)
        out_ref[...] = out


def graph_convolution(feat, adj, weight, bias=None, *, apply_relu=False,
                      adj_dtype=None):
    """One GraphConvolution layer: relu?(adj @ (feat @ W) + b), f32 output.

    `adj` may be the raw (n, n) matrix or one already prepared with
    `prepare_adj` (shared across layers). `adj_dtype` is the HBM streaming
    dtype of the adjacency only (e.g. jnp.bfloat16 halves the dominant N^2
    stream); support stays f32 and accumulation is always f32.
    """
    n, d_in = feat.shape
    d_out = weight.shape[1]
    d_out_pad = _round_up(d_out, 128)              # lane-dense output columns
    n_pad = _pad_n(n)

    adj_p = prepare_adj(adj, adj_dtype=adj_dtype)  # no-op if pre-prepared
    if adj_p.shape != (n_pad, n_pad):
        raise ValueError(
            f"adjacency shape {adj_p.shape} does not match padded node "
            f"count {n_pad} for {n} nodes")

    vmem_limit = _vmem_limit_bytes()
    budget = (vmem_limit * 3) // 4                 # ~25% headroom
    blk_m, blk_k, support_resident = _plan_pass2(
        n_pad, d_out_pad, adj_p.dtype.itemsize, budget)

    d_in_pad, blk_k1 = _plan_pass1(d_in)
    feat_p = feat
    if feat.shape != (n_pad, d_in_pad):
        feat_p = jnp.pad(feat, ((0, n_pad - n), (0, d_in_pad - d_in)))
    w_p = weight
    if weight.shape != (d_in_pad, d_out_pad):
        w_p = jnp.pad(weight, ((0, d_in_pad - d_in), (0, d_out_pad - d_out)))
    if bias is None:
        b_p = jnp.zeros((1, d_out_pad), jnp.float32)
    else:
        b_p = jnp.pad(bias.astype(jnp.float32),
                      (0, d_out_pad - d_out)).reshape(1, d_out_pad)

    # Pass 1: support computed once, stored f32.
    support_p = _compute_support(feat_p, w_p, blk_m, blk_k1, vmem_limit)

    # Pass 2: tiled adj @ support, accumulate directly in the f32 out block.
    kernel = functools.partial(_adj_matmul_kernel, apply_relu=apply_relu,
                               blk_k=blk_k, support_resident=support_resident)
    if support_resident:
        sup_spec = pl.BlockSpec((n_pad, d_out_pad), lambda i, k: (0, 0))
        sup_hbm_reads = 1
    else:
        sup_spec = pl.BlockSpec((blk_k, d_out_pad), lambda i, k: (k, 0))
        sup_hbm_reads = n_pad // blk_m

    adj_itemsize = adj_p.dtype.itemsize
    flops = 2 * n_pad * n_pad * d_out_pad
    bytes_accessed = (n_pad * n_pad * adj_itemsize
                      + sup_hbm_reads * n_pad * d_out_pad * 4
                      + n_pad * d_out_pad * 4)

    out_p = pl.pallas_call(
        kernel,
        out_shape=jax.ShapeDtypeStruct((n_pad, d_out_pad), jnp.float32),
        grid_spec=pltpu.PrefetchScalarGridSpec(
            num_scalar_prefetch=0,
            grid=(n_pad // blk_m, n_pad // blk_k),   # (row tiles, k tiles)
            in_specs=[
                pl.BlockSpec((blk_m, blk_k), lambda i, k: (i, k)),   # adj
                sup_spec,                                            # support
                pl.BlockSpec((1, d_out_pad), lambda i, k: (0, 0)),   # bias
            ],
            out_specs=pl.BlockSpec((blk_m, d_out_pad), lambda i, k: (i, 0)),
        ),
        compiler_params=pltpu.CompilerParams(
            dimension_semantics=("parallel", "arbitrary"),
            vmem_limit_bytes=vmem_limit),
        cost_estimate=pl.CostEstimate(flops=flops, transcendentals=0,
                                      bytes_accessed=bytes_accessed),
    )(adj_p, support_p, b_p)

    return out_p[:n, :d_out]


# --------------------------- GCN encoder (ASN.py) ---------------------------

def init_gcn_params(key, input_dim, hid_dim, emb_dim):
    """Deterministic init matching GraphConvolution.__init__ distributions."""
    def layer(k, d_in, d_out):
        std = 1.0 / math.sqrt(d_out)
        kw, kb = jax.random.split(k)
        w = jax.random.uniform(kw, (d_in, d_out), jnp.float32, -std, std)
        b = jax.random.uniform(kb, (d_out,), jnp.float32, -std, std)
        return w, b

    k1, k2, k3 = jax.random.split(key, 3)
    return {
        "gc1": layer(k1, input_dim, hid_dim),
        "gc2": layer(k2, hid_dim, emb_dim),
        "gc3": layer(k3, hid_dim, emb_dim),
    }


def gcn_forward(params, feat, adj, *, adj_dtype=None):
    """GCN.forward in eval mode: returns (res1, res1, res2)."""
    w1, b1 = params["gc1"]
    w2, b2 = params["gc2"]
    w3, b3 = params["gc3"]
    emb = w2.shape[1]

    # Hoisted: pad + cast adj exactly once; both layers stream this copy.
    adj_p = prepare_adj(adj, adj_dtype=adj_dtype)

    support = graph_convolution(feat, adj_p, w1, b1, apply_relu=True,
                                adj_dtype=adj_dtype)
    # Fuse gc2 + gc3: adj streamed once for both heads (double lane width).
    w23 = jnp.concatenate([w2, w3], axis=1)
    b23 = jnp.concatenate([b2, b3], axis=0)
    res = graph_convolution(support, adj_p, w23, b23, apply_relu=False,
                            adj_dtype=adj_dtype)
    res1, res2 = res[:, :emb], res[:, emb:]
    # F.dropout(..., training=False) is identity.
    return res1, res1, res2


def _make_adj(key, n):
    """Symmetric, row-normalized dense adjacency with self loops."""
    a = (jax.random.uniform(key, (n, n)) > 0.7).astype(jnp.float32)
    a = jnp.maximum(a, a.T) + jnp.eye(n, dtype=jnp.float32)
    return a / jnp.sum(a, axis=1, keepdims=True)


if __name__ == "__main__":
    hp = jax.lax.Precision.HIGHEST
    mm = lambda x, y: jnp.dot(x, y, precision=hp)

    # ------------- small demo: single layer + full GCN encoder -------------
    N = 64
    INPUT_DIM = 16
    HID_DIM = 32
    EMB_DIM = 16
    key = jax.random.PRNGKey(0)
    k_feat, k_adj, k_params, k_feat2, k_adj2 = jax.random.split(key, 5)

    feat = jax.random.normal(k_feat, (N, INPUT_DIM), jnp.float32)
    adj = _make_adj(k_adj, N)
    params = init_gcn_params(k_params, INPUT_DIM, HID_DIM, EMB_DIM)
    w1, b1 = params["gc1"]
    w2, b2 = params["gc2"]
    w3, b3 = params["gc3"]

    layer_out = graph_convolution(feat, adj, w1, b1)
    res1, res1_again, res2 = gcn_forward(params, feat, adj)
    jax.block_until_ready((layer_out, res1, res1_again, res2))

    layer_ref = mm(adj, mm(feat, w1)) + b1
    sup_ref = jnp.maximum(layer_ref, 0.0)
    res1_ref = mm(adj, mm(sup_ref, w2)) + b2
    res2_ref = mm(adj, mm(sup_ref, w3)) + b3

    assert jnp.allclose(layer_out, layer_ref, atol=2e-3, rtol=2e-3)
    assert jnp.allclose(res1, res1_ref, atol=2e-3, rtol=2e-3)
    assert jnp.allclose(res2, res2_ref, atol=2e-3, rtol=2e-3)

    # bf16 adjacency streaming (support stays f32, f32 accumulation).
    res1_bf, _, res2_bf = gcn_forward(params, feat, adj,
                                      adj_dtype=jnp.bfloat16)
    jax.block_until_ready((res1_bf, res2_bf))
    assert jnp.allclose(res1_bf, res1_ref, atol=2e-2, rtol=2e-2)
    assert jnp.allclose(res2_bf, res2_ref, atol=2e-2, rtol=2e-2)

    # ------ larger single layer: exercises blk_m=256 / blk_k tiling, ------
    # ------ VMEM-resident support slicing, and megacore row sharding ------
    N2 = 1500
    feat2 = jax.random.normal(k_feat2, (N2, INPUT_DIM), jnp.float32)
    adj2 = _make_adj(k_adj2, N2)

    out2 = graph_convolution(feat2, adj2, w1, b1, apply_relu=True)
    out2_bf = graph_convolution(feat2, adj2, w1, b1, apply_relu=True,
                                adj_dtype=jnp.bfloat16)
    jax.block_until_ready((out2, out2_bf))

    out2_ref = jnp.maximum(mm(adj2, mm(feat2, w1)) + b1, 0.0)
    assert jnp.allclose(out2, out2_ref, atol=2e-3, rtol=2e-3)
    assert jnp.allclose(out2_bf, out2_ref, atol=2e-2, rtol=2e-2)

    print("KERNEL_OK")
</pallas_src>

<mosaic_0001>
module attributes {stable_mosaic.version = 11 : i64} {
  func.func @_support_kernel(%arg0: i32, %arg1: i32, %arg2: memref<64x16xf32, #tpu.memory_space<vmem>>, %arg3: memref<16x128xf32, #tpu.memory_space<vmem>>, %arg4: memref<64x128xf32, #tpu.memory_space<vmem>>) attributes {dimension_semantics = [#tpu.dimension_semantics<parallel>, #tpu.dimension_semantics<arbitrary>], iteration_bounds = array<i64: 1, 1>, scalar_prefetch = 0 : i64, scratch_operands = 0 : i64, tpu.core_type = #tpu.core_type<tc>, window_params = [{transform_indices = @transform_0, window_bounds = array<i64: 64, 16>}, {transform_indices = @transform_1, window_bounds = array<i64: 16, 128>}, {transform_indices = @transform_2, window_bounds = array<i64: 64, 128>}]} {
    %c0_i32 = arith.constant 0 : i32
    %0 = arith.cmpi eq, %arg1, %c0_i32 : i32
    %1 = arith.extui %0 : i1 to i32
    %c0_i32_0 = arith.constant 0 : i32
    %2 = arith.cmpi ne, %1, %c0_i32_0 : i32
    scf.if %2 {
      %cst_8 = arith.constant 0.000000e+00 : f32
      %9 = vector.broadcast %cst_8 : f32 to vector<64x128xf32>
      %c0_9 = arith.constant 0 : index
      %c0_10 = arith.constant 0 : index
      %10 = vector.load %arg4[%c0_9, %c0_10] : memref<64x128xf32, #tpu.memory_space<vmem>>, vector<64x128xf32>
      tpu.vector_store %arg4[%c0_9, %c0_10], %9 {strides = array<i32>} : memref<64x128xf32, #tpu.memory_space<vmem>>, vector<64x128xf32>,
    } else {
    }
    %c0 = arith.constant 0 : index
    %c0_1 = arith.constant 0 : index
    %3 = vector.load %arg4[%c0, %c0_1] : memref<64x128xf32, #tpu.memory_space<vmem>>, vector<64x128xf32>
    %c0_2 = arith.constant 0 : index
    %c0_3 = arith.constant 0 : index
    %4 = vector.load %arg2[%c0_2, %c0_3] : memref<64x16xf32, #tpu.memory_space<vmem>>, vector<64x16xf32>
    %c0_4 = arith.constant 0 : index
    %c0_5 = arith.constant 0 : index
    %5 = vector.load %arg3[%c0_4, %c0_5] : memref<16x128xf32, #tpu.memory_space<vmem>>, vector<16x128xf32>
    %cst = arith.constant dense<0.000000e+00> : vector<64x128xf32>
    %6 = tpu.matmul %4, %5, %cst {dimension_numbers = #tpu.dot_dimension_numbers<[1], [0], [0], [1], [0, 0, 1, 1], [], []>} : vector<64x16xf32>, vector<16x128xf32>, vector<64x128xf32> -> vector<64x128xf32>
    %7 = arith.addf %3, %6 : vector<64x128xf32>
    %c0_6 = arith.constant 0 : index
    %c0_7 = arith.constant 0 : index
    %8 = vector.load %arg4[%c0_6, %c0_7] : memref<64x128xf32, #tpu.memory_space<vmem>>, vector<64x128xf32>
    tpu.vector_store %arg4[%c0_6, %c0_7], %7 {strides = array<i32>} : memref<64x128xf32, #tpu.memory_space<vmem>>, vector<64x128xf32>,
    return
  }
  func.func @transform_0(%arg0: i32, %arg1: i32) -> (i32, i32) {
    %c0_i32 = arith.constant 0 : i32
    return %arg0, %arg1 : i32, i32
  }
  func.func @transform_1(%arg0: i32, %arg1: i32) -> (i32, i32) {
    %c0_i32 = arith.constant 0 : i32
    %c0_i32_0 = arith.constant 0 : i32
    return %arg1, %c0_i32 : i32, i32
  }
  func.func @transform_2(%arg0: i32, %arg1: i32) -> (i32, i32) {
    %c0_i32 = arith.constant 0 : i32
    %c0_i32_0 = arith.constant 0 : i32
    return %arg0, %c0_i32 : i32, i32
  }
}

</mosaic_0001>

<bundles_post_ra>
// kernel: tpu_custom_call.1
= control target key start
LH: loop header
LB: loop body
LE: loop exit
PB: predicated region body
PF: predicated region fallthrough
CT: control target
= control target key end

     0   :  { %vm42_vm0 = vcmask 130048   ;;  %s340_s0 = inlined_call_operand.vmem [shape: f32[64,16], index: 0, kind: input, shape index: {}]   ;;  %s341_s1 = inlined_call_operand.vmem [shape: f32[16,128], index: 1, kind: input, shape index: {}]   ;;  %s342_s2 = inlined_call_operand.hbm [shape: f32[64,128], index: 2, kind: output, shape index: {}]  }
   0x1   :  { %v40_v0 = vld [vmem:[%s341_s1] sm:$0xff]  ;;  %v41_v1 = vld [vmem:[%s341_s1 + $0x8] sm:$0xff] }
   0x2   :  { %v32_v2 = vld [vmem:[%s340_s0] sm:$0xff]  ;;  %v238_v3 = vpack.c.bf16 %v41_v1, %v40_v0 }
   0x3   :  { %226 = vmatprep.mubr.msk.f32.mxu0 %vm42_vm0, %v32_v2  ;;  %v36_v4 = vld [vmem:[%s340_s0 + $0x20] sm:$0xff] }
   0x4   :  { %232 = vmatprep.mubr.msk.f32.mxu1 %vm42_vm0, %v36_v4  ;;  %239 = vmatprep.subr.bf16.mxu0 %v238_v3 }
   0x5   :  { %242 = vmatprep.subr.bf16.mxu1 %v238_v3 }
   0x6   :  { %7 = vsyncpa [#allocation3], 0  ;;  %241 = vmatpush3.bf16.msra.mxu0 %v238_v3  ;;  %243 = vmatpush3.bf16.msra.mxu1 %v238_v3  ;;  %v33_v5 = vld [vmem:[%s340_s0 + $0x8] sm:$0xff]  ;;  %v34_v7 = vld [vmem:[%s340_s0 + $0x10] sm:$0xff]  ;;  %s272_s28 = smov [#allocation2]  }
   0x7   :  { %v37_v6 = vld [vmem:[%s340_s0 + $0x28] sm:$0xff]  ;;  %v38_v8 = vld [vmem:[%s340_s0 + $0x30] sm:$0xff]  ;;  %v35_v9 = vld [vmem:[%s340_s0 + $0x18] sm:$0xff]  ;;  %s193_s29 = sshll.u32 %s272_s28, 4  ;;  %s194_s29 = int_to_ptr.vmem [resolvable:$true] %s193_s29 }
   0x8   :  { %v39_v10 = vld [vmem:[%s340_s0 + $0x38] sm:$0xff]  ;;  %s248_s0 = scalar_lea.vmem %s194_s29, 1024  ;;  %p253_p1 = scmp.lt.s32.totalorder %s194_s29, %s194_s29 }
   0x9   :  { %227 = vmatmul.mubr.msk.f32.vlgmr.msra.gmra.mrb[0].mxu0 %vm42_vm0, %v33_v5  ;;  %233 = vmatmul.mubr.msk.f32.vlgmr.msra.gmra.mrb[0].mxu1 %vm42_vm0, %v37_v6  ;;  %p249_p0 = scmp.ne.s32.totalorder %s194_s29, %s248_s0  ;;  %p254_p2 = scmp.lt.s32.totalorder %s248_s0, %s248_s0 }
   0xa   :  { %229 = vmatprep.mubr.msk.f32.mxu0 %vm42_vm0, %v34_v7  ;;  %235 = vmatprep.mubr.msk.f32.mxu1 %vm42_vm0, %v38_v8 }
   0xb   :  { %p255_p3 = por %p254_p2, %p253_p1 }
   0xd   :  { %230 = vmatmul.mubr.msk.f32.gmra.mrb[2].mxu0 %vm42_vm0, %v35_v9  ;;  %236 = vmatmul.mubr.msk.f32.gmra.mrb[2].mxu1 %vm42_vm0, %v39_v10  ;;  %p256_p4 = pnand %p255_p3, %p249_p0 }
  0xdc   :  { %v228_v11 = vpop.f32.mrb[0].mxu0  ;;  %v234_v12 = vpop.f32.mrb[0].mxu1 }
  0xdd   :  { %v133_v13 = vpop.f32.mrb[1].mxu0  ;;  %v153_v14 = vpop.f32.mrb[1].mxu1  ;;  %181 = vst [vmem:[#allocation2 + $0x8] sm:$0xff] %v228_v11  ;;  %185 = vst [vmem:[#allocation2 + $0x28] sm:$0xff] %v234_v12 }
  0xde   :  { %180 = vst [vmem:[#allocation2] sm:$0xff] %v133_v13  ;;  %184 = vst [vmem:[#allocation2 + $0x20] sm:$0xff] %v153_v14 }
  0xe0   :  { %v231_v15 = vpop.f32.mrb[2].mxu0  ;;  %v237_v16 = vpop.f32.mrb[2].mxu1 }
  0xe1   :  { %v143_v17 = vpop.f32.mrb[3].mxu0  ;;  %v163_v18 = vpop.f32.mrb[3].mxu1  ;;  %183 = vst [vmem:[#allocation2 + $0x18] sm:$0xff] %v231_v15  ;;  %187 = vst [vmem:[#allocation2 + $0x38] sm:$0xff] %v237_v16 }
  0xe2   :  { %182 = vst [vmem:[#allocation2 + $0x10] sm:$0xff] %v143_v17  ;;  %186 = vst [vmem:[#allocation2 + $0x30] sm:$0xff] %v163_v18 }
  0xe3   :  { %259 = shalt.err (!%p256_p4)
}
  0xe4   :  { %s260_s4 = scalar_lea.hbm %s342_s2, 1024 }
  0xe5   :  { %p261_p5 = scmp.ne.s32.totalorder %s342_s2, %s260_s4  ;;  %p264_p6 = scmp.lt.u32.totalorder %s260_s4, %s342_s2 }
  0xe7   :  { %p266_p7 = pnand %p264_p6, %p261_p5 }
  0xe9   :  { %269 = shalt.err (!%p266_p7)
}
  0xea   :  { %s273_s9 = smov 128   ;;  %s274_s10 = smov 8  }
  0xeb   :  { %199 = dma.vmem_to_hbm [thread:$0]  %s194_s29, 1024, %s342_s2, [#allocation3], %s273_s9, %s273_s9, %s274_s10  }
  0xec   :  { %270 = dma.done.wait [#allocation3], 1024  }
  0xed   :  { %271 = vsyncadd [#allocation3], 4294966272 }
  0xee   :  { %203 = vsyncpa [#allocation3], 1 }

</bundles_post_ra>
